<compile_context>
chip_gen: v6e
topology: v6e:2x2x1
jax: 0.10.0
libtpu: 0.0.40
codegen_flags: <defaults>
</compile_context>

<pallas_src>
from functools import partial

import jax
import jax.numpy as jnp
from jax.experimental import pallas as pl
from jax.experimental.pallas import tpu as pltpu

_VMEM = pltpu.MemorySpace.VMEM
_LANES = 128           # lane width of a vreg
_BF16_SUBLANES = 16    # bf16 sublane packing (one bf16 vreg is [16, 128])


def _round_up(n, m):
    return ((n + m - 1) // m) * m


def _discriminator_kernel(x_ref, p_ref, o_ref, *, d_in, h_pad,
                          b1_row, w2_row0, b2_row):
    """Fused 2-layer MLP.  p_ref is the packed bf16 parameter slab:
         rows [0:d_in]              -> W1.T  (d_in, h_pad)
         row  [b1_row]              -> b1    (broadcast row)
         rows [w2_row0:w2_row0+h_pad]-> W2.T (h_pad, o_pad)
         row  [b2_row]              -> b2    (broadcast row)
    """
    # fc1: bf16 operands on the MXU, f32 accumulation. K = d_in is ragged
    # (100); Mosaic masks the remainder internally — no x padding needed.
    x = x_ref[...].astype(jnp.bfloat16)
    h = jnp.dot(x, p_ref[0:d_in, :], preferred_element_type=jnp.float32)
    # f32 epilogue: bias add + ReLU (bias values were rounded once to bf16 at
    # prep time; the arithmetic here is f32).
    h = jnp.maximum(h + p_ref[b1_row:b1_row + 1, :].astype(jnp.float32), 0.0)

    # fc2: cast only the matmul operand to bf16; accumulator stays f32.
    y = jnp.dot(h.astype(jnp.bfloat16),
                p_ref[w2_row0:w2_row0 + h_pad, :],
                preferred_element_type=jnp.float32)
    # f32 epilogue: bias add + sigmoid (EUP slot, effectively free here).
    o_ref[...] = jax.nn.sigmoid(y + p_ref[b2_row:b2_row + 1, :].astype(jnp.float32))


def prepare_params(w1, b1, w2, b2):
    """One-time prep: transpose to [in, out], zero-pad feature dims to 128
    lanes, and pack everything into a single bf16 slab (one DMA per call).

    PyTorch nn.Linear layout: w1 [H, D_in], b1 [H], w2 [D_out, H], b2 [D_out].
    """
    H, D_in = w1.shape
    D_out = w2.shape[0]
    h_pad = _round_up(H, _LANES)          # 32  -> 128
    o_pad = _round_up(D_out, _LANES)      # 50  -> 128
    width = max(h_pad, o_pad)             # slab lane width

    # 16-sublane-aligned row layout inside the slab.
    w1_rows = _round_up(D_in, _BF16_SUBLANES)   # 100 -> 112
    b1_row = w1_rows                            # 112
    w2_row0 = b1_row + _BF16_SUBLANES           # 128
    b2_row = w2_row0 + h_pad                    # 256
    rows = b2_row + _BF16_SUBLANES              # 272

    slab = jnp.zeros((rows, width), jnp.bfloat16)
    slab = slab.at[:D_in, :H].set(w1.T.astype(jnp.bfloat16))
    slab = slab.at[b1_row, :H].set(b1.astype(jnp.bfloat16))
    slab = slab.at[w2_row0:w2_row0 + H, :D_out].set(w2.T.astype(jnp.bfloat16))
    slab = slab.at[b2_row, :D_out].set(b2.astype(jnp.bfloat16))

    meta = dict(d_in=D_in, d_out=D_out, h_pad=h_pad, o_pad=o_pad,
                b1_row=b1_row, w2_row0=w2_row0, b2_row=b2_row)
    return slab, meta


def make_discriminator(w1, b1, w2, b2):
    """Returns (apply_fn, params_slab).  apply_fn(x, params_slab) -> [B, D_out]."""
    slab, meta = prepare_params(w1, b1, w2, b2)
    kernel = partial(_discriminator_kernel,
                     d_in=meta["d_in"], h_pad=meta["h_pad"],
                     b1_row=meta["b1_row"], w2_row0=meta["w2_row0"],
                     b2_row=meta["b2_row"])
    d_out, o_pad = meta["d_out"], meta["o_pad"]

    @jax.jit
    def apply(x, params_slab):
        B = x.shape[0]
        # Gridless single invocation: x (B, D_in) and the param slab are
        # whole-array VMEM blocks (no (8,128) divisibility requirement),
        # output is a lane-dense (B, 128) slab.
        # NOTE: if B grows to many hundreds of rows, switch to a 1-D batch
        # grid with dimension_semantics=("parallel",) so v7x's two
        # TensorCores both get work; weights stay resident via
        # index_map=lambda i: (0, 0).
        y_pad = pl.pallas_call(
            kernel,
            out_shape=jax.ShapeDtypeStruct((B, o_pad), jnp.float32),
            in_specs=[pl.BlockSpec(memory_space=_VMEM),
                      pl.BlockSpec(memory_space=_VMEM)],
            out_specs=pl.BlockSpec(memory_space=_VMEM),
        )(x, params_slab)
        return y_pad[:, :d_out]

    return apply, slab


if __name__ == "__main__":
    # Shapes implied by the module: input_dim=100, output_dim=50; hidden=32, batch=8.
    B, D_in, H, D_out = 8, 100, 32, 50

    key = jax.random.PRNGKey(0)
    kx, kw1, kb1, kw2, kb2 = jax.random.split(key, 5)

    x = jax.random.normal(kx, (B, D_in), dtype=jnp.float32)
    # PyTorch nn.Linear parameter shapes: weight [out, in], bias [out].
    w1 = jax.random.normal(kw1, (H, D_in), dtype=jnp.float32) * 0.05
    b1 = jax.random.normal(kb1, (H,), dtype=jnp.float32) * 0.05
    w2 = jax.random.normal(kw2, (D_out, H), dtype=jnp.float32) * 0.05
    b2 = jax.random.normal(kb2, (D_out,), dtype=jnp.float32) * 0.05

    # One-time parameter prep (hoisted out of the per-call path).
    apply_fn, slab = make_discriminator(w1, b1, w2, b2)
    slab = jax.block_until_ready(slab)

    out = jax.block_until_ready(apply_fn(x, slab))
    assert out.shape == (B, D_out)

    # Reference 1: numerics-matched JAX (same bf16 matmul operands, f32
    # accumulation / epilogue) — tight tolerance.
    xb = x.astype(jnp.bfloat16)
    w1b = w1.astype(jnp.bfloat16)
    w2b = w2.astype(jnp.bfloat16)
    b1f = b1.astype(jnp.bfloat16).astype(jnp.float32)
    b2f = b2.astype(jnp.bfloat16).astype(jnp.float32)
    h_ref = jnp.maximum(
        jnp.dot(xb, w1b.T, preferred_element_type=jnp.float32) + b1f, 0.0)
    ref_matched = jax.nn.sigmoid(
        jnp.dot(h_ref.astype(jnp.bfloat16), w2b.T,
                preferred_element_type=jnp.float32) + b2f)
    assert jnp.allclose(out, ref_matched, atol=1e-4, rtol=1e-4)

    # Reference 2: full-f32 PyTorch forward semantics — bf16 operand rounding
    # with 0.05-scale weights keeps the error well inside this bound.
    ref_f32 = jax.nn.sigmoid(jnp.maximum(x @ w1.T + b1, 0.0) @ w2.T + b2)
    assert jnp.allclose(out, ref_f32, atol=5e-3, rtol=5e-2)

    print("KERNEL_OK")
</pallas_src>

<mosaic_0001>
module attributes {stable_mosaic.version = 11 : i64} {
  func.func @_discriminator_kernel(%arg0: memref<8x100xf32, #tpu.memory_space<vmem>>, %arg1: memref<272x128xbf16, #tpu.memory_space<vmem>>, %arg2: memref<8x128xf32, #tpu.memory_space<vmem>>) attributes {dimension_semantics = [], scalar_prefetch = 0 : i64, scratch_operands = 0 : i64, tpu.core_type = #tpu.core_type<tc>} {
    %c0 = arith.constant 0 : index
    %c0_0 = arith.constant 0 : index
    %0 = vector.load %arg0[%c0, %c0_0] : memref<8x100xf32, #tpu.memory_space<vmem>>, vector<8x100xf32>
    %1 = arith.truncf %0 : vector<8x100xf32> to vector<8x100xbf16>
    %c0_1 = arith.constant 0 : index
    %c0_2 = arith.constant 0 : index
    %2 = vector.load %arg1[%c0_1, %c0_2] : memref<272x128xbf16, #tpu.memory_space<vmem>>, vector<100x128xbf16>
    %cst = arith.constant dense<0.000000e+00> : vector<8x128xf32>
    %3 = tpu.matmul %1, %2, %cst {dimension_numbers = #tpu.dot_dimension_numbers<[1], [0], [0], [1], [0, 0, 1, 1], [], []>} : vector<8x100xbf16>, vector<100x128xbf16>, vector<8x128xf32> -> vector<8x128xf32>
    %c112 = arith.constant 112 : index
    %c0_3 = arith.constant 0 : index
    %4 = vector.load %arg1[%c112, %c0_3] : memref<272x128xbf16, #tpu.memory_space<vmem>>, vector<1x128xbf16>
    %5 = arith.extf %4 : vector<1x128xbf16> to vector<1x128xf32>
    %6 = vector.broadcast %5 : vector<1x128xf32> to vector<8x128xf32>
    %7 = arith.addf %3, %6 : vector<8x128xf32>
    %cst_4 = arith.constant 0.000000e+00 : f32
    %8 = vector.broadcast %cst_4 : f32 to vector<8x128xf32>
    %9 = arith.maximumf %7, %8 : vector<8x128xf32>
    %10 = arith.truncf %9 : vector<8x128xf32> to vector<8x128xbf16>
    %c128 = arith.constant 128 : index
    %c0_5 = arith.constant 0 : index
    %11 = vector.load %arg1[%c128, %c0_5] : memref<272x128xbf16, #tpu.memory_space<vmem>>, vector<128x128xbf16>
    %cst_6 = arith.constant dense<0.000000e+00> : vector<8x128xf32>
    %12 = tpu.matmul %10, %11, %cst_6 {dimension_numbers = #tpu.dot_dimension_numbers<[1], [0], [0], [1], [0, 0, 1, 1], [], []>} : vector<8x128xbf16>, vector<128x128xbf16>, vector<8x128xf32> -> vector<8x128xf32>
    %c256 = arith.constant 256 : index
    %c0_7 = arith.constant 0 : index
    %13 = vector.load %arg1[%c256, %c0_7] : memref<272x128xbf16, #tpu.memory_space<vmem>>, vector<1x128xbf16>
    %14 = arith.extf %13 : vector<1x128xbf16> to vector<1x128xf32>
    %15 = vector.broadcast %14 : vector<1x128xf32> to vector<8x128xf32>
    %16 = arith.addf %12, %15 : vector<8x128xf32>
    %17 = arith.negf %16 : vector<8x128xf32>
    %18 = math.exp %17 : vector<8x128xf32>
    %cst_8 = arith.constant 1.000000e+00 : f32
    %19 = vector.broadcast %cst_8 : f32 to vector<8x128xf32>
    %20 = arith.addf %19, %18 : vector<8x128xf32>
    %21 = arith.divf %19, %20 : vector<8x128xf32>
    %c0_9 = arith.constant 0 : index
    %c0_10 = arith.constant 0 : index
    %22 = vector.load %arg2[%c0_9, %c0_10] : memref<8x128xf32, #tpu.memory_space<vmem>>, vector<8x128xf32>
    tpu.vector_store %arg2[%c0_9, %c0_10], %21 {strides = array<i32>} : memref<8x128xf32, #tpu.memory_space<vmem>>, vector<8x128xf32>,
    return
  }
}

</mosaic_0001>

<bundles_post_ra>
// kernel: apply.1
= control target key start
LH: loop header
LB: loop body
LE: loop exit
PB: predicated region body
PF: predicated region fallthrough
CT: control target
= control target key end

     0   :  { %7 = vsyncpa [#allocation3], 0  ;;  %s477_s0 = inlined_call_operand.hbm [shape: f32[8,100], index: 0, kind: input, shape index: {}]   ;;  %s478_s1 = inlined_call_operand.hbm [shape: bf16[272,128], index: 1, kind: input, shape index: {}]   ;;  %s479_s2 = inlined_call_operand.hbm [shape: f32[8,128], index: 2, kind: output, shape index: {}]  }
   0x1   :  { %8 = vsyncpa [#allocation6], 0 }
   0x2   :  { %9 = vsyncpa [#allocation4], 0  ;;  %s446_s9 = smov [#allocation2]   ;;  %s447_s11 = smov [#allocation5]  }
   0x3   :  { %s16_s10 = sshll.u32 %s446_s9, 4  ;;  %s25_s12 = sshll.u32 %s447_s11, 4  ;;  %s17_s10 = int_to_ptr.vmem [resolvable:$true] %s16_s10  ;;  %s26_s12 = int_to_ptr.vmem [resolvable:$true] %s25_s12 }
   0x4   :  { %s388_s13 = scalar_lea.vmem %s17_s10, 128  ;;  %p393_p1 = scmp.lt.s32.totalorder %s17_s10, %s17_s10 }
   0x5   :  { %p389_p0 = scmp.ne.s32.totalorder %s17_s10, %s388_s13  ;;  %p394_p2 = scmp.lt.s32.totalorder %s388_s13, %s388_s13 }
   0x7   :  { %p395_p3 = por %p394_p2, %p393_p1 }
   0x9   :  { %p396_p4 = pnand %p395_p3, %p389_p0 }
   0xb   :  { %399 = shalt.err (!%p396_p4)
}
   0xc   :  { %19 = dma.hbm_to_vmem [thread:$0]  %s477_s0, 128, %s17_s10, [#allocation3]  }
   0xd   :  { %s408_s16 = scalar_lea.vmem %s26_s12, 2176  ;;  %p413_p6 = scmp.lt.s32.totalorder %s26_s12, %s26_s12 }
   0xe   :  { %p409_p5 = scmp.ne.s32.totalorder %s26_s12, %s408_s16  ;;  %p414_p7 = scmp.lt.s32.totalorder %s408_s16, %s408_s16 }
  0x10   :  { %p415_p8 = por %p414_p7, %p413_p6 }
  0x12   :  { %p416_p9 = pnand %p415_p8, %p409_p5 }
  0x14   :  { %419 = shalt.err (!%p416_p9)
}
  0x15   :  { %s448_s17 = smov 64   ;;  %s449_s18 = smov 4  }
  0x16   :  { %31 = dma.hbm_to_vmem [thread:$0]  %s478_s1, 2176, %s26_s12, [#allocation6], %s448_s17, %s448_s17, %s449_s18  }
  0x17   :  { %440 = dma.done.wait [#allocation3], 128  }
  0x18   :  { %441 = vsyncadd [#allocation3], 4294967168 }
  0x19   :  { %442 = dma.done.wait [#allocation6], 2176  }
  0x1a   :  { %443 = vsyncadd [#allocation6], 4294965120  ;;  %v450_v0 = vmov 0.0   ;;  %vm451_vm0 = vmmov 0   ;;  %vm103_vm1 = vcmask 1041408   ;;  %v362_v3 = vld [vmem:[#allocation5 + $0x28] sm:$0xff]   ;;  %v56_v19 = vlaneseq }
  0x1b   :  { %316 = vmatprep.subr.bf16.mxu0 %v450_v0  ;;  %330 = vmatprep.mubr.msk.bf16.mxu0 %vm451_vm0, %v450_v0  ;;  %v361_v1 = vld [vmem:[#allocation5 + $0x30] ss:$0 sps:$4 sm:$0x33]   ;;  %v363_v4 = vld [vmem:[#allocation5 + $0x20] sm:$0xff]   ;;  %v368_v5 = vld [vmem:[#allocation5 + $0x78] sm:$0xff]   ;;  %vm99_vm2 = vcmask 818176  }
  0x1c   :  { %334 = vmatprep.subr.bf16.mxu1 %v450_v0  ;;  %350 = vmatprep.mubr.msk.bf16.mxu1 %vm451_vm0, %v450_v0  ;;  %v105_v2 = vsel %vm103_vm1, %v361_v1, 0  ;;  %v369_v6 = vld [vmem:[#allocation5 + $0x70] sm:$0xff]   ;;  %v364_v7 = vld [vmem:[#allocation5 + $0x18] sm:$0xff]   ;;  %v370_v8 = vld [vmem:[#allocation5 + $0x68] sm:$0xff]   ;;  %v57_v20 = vshrl.u32 %v56_v19, 7  ;;  %s452_s0 = smov [#allocation7]  }
  0x1d   :  { %317 = vmatpush3.bf16.msra.mxu0 %v105_v2  ;;  %335 = vmatpush3.bf16.msra.mxu1 %v368_v5  ;;  %v365_v9 = vld [vmem:[#allocation5 + $0x10] sm:$0xff]   ;;  %v371_v10 = vld [vmem:[#allocation5 + $0x60] sm:$0xff]   ;;  %v366_v11 = vld [vmem:[#allocation5 + $0x8] sm:$0xff]   ;;  %s272_s1 = sshll.u32 %s452_s0, 4  ;;  %s273_s1 = int_to_ptr.vmem [resolvable:$true] %s272_s1 }
  0x1e   :  { %318 = vmatprep.subr.bf16.mxu0 %v450_v0  ;;  %336 = vmatprep.subr.bf16.mxu1 %v450_v0  ;;  %v372_v12 = vld [vmem:[#allocation5 + $0x58] sm:$0xff]   ;;  %v367_v13 = vld [vmem:[#allocation5] sm:$0xff]   ;;  %v373_v15 = vld [vmem:[#allocation5 + $0x50] sm:$0xff]   ;;  %v58_v23 = vsub.s32 0, %v57_v20  ;;  %s420_s21 = scalar_lea.vmem %s273_s1, 128  ;;  %p425_p11 = scmp.lt.s32.totalorder %s273_s1, %s273_s1 }
  0x1f   :  { %v39_v14 = vld [vmem:[#allocation2] sm:$0xff]  ;;  %v374_v17 = vld [vmem:[#allocation5 + $0x48] sm:$0xff]   ;;  %v375_v18 = vld [vmem:[#allocation5 + $0x40] sm:$0xff]   ;;  %p421_p10 = scmp.ne.s32.totalorder %s273_s1, %s420_s21  ;;  %p426_p12 = scmp.lt.s32.totalorder %s420_s21, %s420_s21 }
  0x20   :  { %v40_v16 = vpack.c.bf16 %v39_v14, %v39_v14  ;;  %v54_v21 = vld [vmem:[#allocation5 + $0x38] sm:$0x1]  ;;  %v165_v32 = vld [vmem:[#allocation5 + $0x80] sm:$0x1] }
  0x21   :  { %319 = vmatpush3.bf16.msra.mxu0 %v362_v3  ;;  %337 = vmatpush3.bf16.msra.mxu1 %v369_v6  ;;  %v55_v22 = vunpack.c.l.bf16 %v54_v21  ;;  %v166_v33 = vunpack.c.l.bf16 %v165_v32  ;;  %p427_p13 = por %p426_p12, %p425_p11 }
  0x22   :  { %320 = vmatprep.subr.bf16.mxu0 %v450_v0  ;;  %338 = vmatprep.subr.bf16.mxu1 %v450_v0 }
  0x23   :  { %v59_v24 = vrot.slane %v55_v22, %v58_v23  ;;  %v170_v34 = vrot.slane %v166_v33, %v58_v23  ;;  %p428_p0 = pnand %p427_p13, %p421_p10 }
  0x25   :  { %321 = vmatpush3.bf16.msra.mxu0 %v363_v4  ;;  %339 = vmatpush3.bf16.msra.mxu1 %v370_v8 }
  0x26   :  { %322 = vmatprep.subr.bf16.mxu0 %v450_v0  ;;  %340 = vmatprep.subr.bf16.mxu1 %v450_v0 }
  0x29   :  { %323 = vmatpush3.bf16.msra.mxu0 %v364_v7  ;;  %341 = vmatpush3.bf16.msra.mxu1 %v371_v10 }
  0x2a   :  { %324 = vmatprep.subr.bf16.mxu0 %v450_v0  ;;  %342 = vmatprep.subr.bf16.mxu1 %v450_v0 }
  0x2d   :  { %325 = vmatpush3.bf16.msra.mxu0 %v365_v9  ;;  %343 = vmatpush3.bf16.msra.mxu1 %v372_v12 }
  0x2e   :  { %326 = vmatprep.subr.bf16.mxu0 %v450_v0  ;;  %344 = vmatprep.subr.bf16.mxu1 %v450_v0 }
  0x31   :  { %327 = vmatpush3.bf16.msra.mxu0 %v366_v11  ;;  %345 = vmatpush3.bf16.msra.mxu1 %v373_v15 }
  0x32   :  { %328 = vmatprep.subr.bf16.mxu0 %v450_v0  ;;  %346 = vmatprep.subr.bf16.mxu1 %v450_v0 }
  0x35   :  { %329 = vmatpush3.bf16.msra.mxu0 %v367_v13  ;;  %347 = vmatpush3.bf16.msra.mxu1 %v374_v17 }
  0x36   :  { %348 = vmatprep.subr.bf16.mxu1 %v450_v0 }
  0x38   :  { %331 = vmatmul.mubr.msk.bf16.vlgmr.msra.gmra.mxu0 %vm99_vm2, %v40_v16 }
  0x39   :  { %349 = vmatpush3.bf16.msra.mxu1 %v375_v18 }
  0xf8   :  { %v141_v25 = vpop.f32.mrf.mxu0 }
  0xf9   :  { %v142_v26 = vadd.f32 %v141_v25, %v59_v24 }
  0xfa   :  { %v332_v27 = vpop.f32.mrf.mxu0 }
  0xfb   :  { %v147_v28 = vmax.f32 %v142_v26, 0.0 }
  0xfc   :  { %v144_v29 = vpop.f32.mrf.mxu0 }
  0xfd   :  { %v148_v30 = vpack.c.bf16 %v147_v28, %v147_v28 }
  0xfe   :  { %v333_v31 = vpop.f32.mrf.mxu0 }
  0xff   :  { %351 = vmatmul.mubr.bf16.vlgmr.msra.gmra.mxu1 %v148_v30 }
 0x1bf   :  { %v253_v35 = vpop.f32.mrf.mxu1 }
 0x1c0   :  { %v254_v36 = vadd.f32 %v253_v35, %v170_v34 }
 0x1c1   :  { %v352_v37 = vpop.f32.mrf.mxu1 }
 0x1c2   :  { %v298_v38 = vmul.f32 -1.442695, %v254_v36 }
 0x1c3   :  { %v256_v39 = vpop.f32.mrf.mxu1 }
 0x1c4   :  { %376 = vpow2.f32 %v298_v38 }
 0x1c5   :  { %v353_v40 = vpop.f32.mrf.mxu1 }
 0x1d1   :  { %v377_v41 = vpop.eup %376 }
 0x1d2   :  { %v262_v42 = vadd.f32 1.0, %v377_v41 }
 0x1d4   :  { %378 = vrcp.f32 %v262_v42 }
 0x1e1   :  { %v379_v43 = vpop.eup %378 }
 0x1e2   :  { %265 = vst [vmem:[#allocation7] sm:$0xff] %v379_v43 }
 0x1e3   :  { %431 = shalt.err (!%p428_p0)
}
 0x1e4   :  { %275 = dma.vmem_to_hbm [thread:$0]  %s273_s1, 128, %s479_s2, [#allocation4]  }
 0x1e5   :  { %444 = dma.done.wait [#allocation4], 128  }
 0x1e6   :  { %445 = vsyncadd [#allocation4], 4294967168 }
 0x1e7   :  { %279 = vsyncpa [#allocation3], 1 }
 0x1e8   :  { %280 = vsyncpa [#allocation6], 1 }
 0x1e9   :  { %281 = vsyncpa [#allocation4], 1 }

</bundles_post_ra>
